<compile_context>
chip_gen: v7x
topology: tpu7x:2x2x1
jax: 0.10.0
libtpu: 0.0.40
codegen_flags: <defaults>
</compile_context>

<pallas_src>
import functools

import jax
import jax.numpy as jnp
from jax.experimental import pallas as pl
from jax.experimental.pallas import tpu as pltpu


def _ceil_to(a, m):
    return -(-a // m) * m


def _vmem_bytes(shape, dtype):
    """Approximate VMEM footprint of an array incl. (sublane, lane) padding."""
    item = jnp.dtype(dtype).itemsize
    sub = 8 * (4 // item)                      # 8 sublanes for f32 tiles, 16 for bf16
    dims = (1, 1) + tuple(int(d) for d in shape)
    lead = 1
    for d in dims[:-2]:
        lead *= d
    return lead * _ceil_to(dims[-2], sub) * _ceil_to(dims[-1], 128) * item


def _vmem_budget_bytes():
    """Per-generation working budget (leave headroom for Mosaic internals)."""
    try:
        cap = pltpu.get_tpu_info().vmem_capacity_bytes
    except Exception:                          # older/newer API variants
        cap = 64 * 2 ** 20                     # v7x per-TensorCore VMEM (smallest gen)
    return min(cap // 3, 40 * 2 ** 20)


def _const_block_spec(block_shape, index_map):
    """Constant-index operand (same block every step): single-buffer if supported."""
    try:
        return pl.BlockSpec(block_shape, index_map, pipeline_mode=pl.Buffered(1))
    except (AttributeError, TypeError, ValueError):
        return pl.BlockSpec(block_shape, index_map)


def _convblock_kernel(x_ref, w_ref, scale_ref, bias_ref, o_ref, y_scr, *,
                      kh, kw, cin, bhc, wc_eff, pool):
    """One (batch, row-block) step: conv taps -> BN affine -> ReLU -> maxpool.

    x_ref:     (Hp, Wp, Cin)          padded NHWC image (resident across row-blocks)
    w_ref:     (kh*kw, Cin, Cout)     conv weights, one (Cin, Cout) slab per tap
    scale_ref: (1, Cout)              folded BN scale = gamma / sqrt(var + eps)
    bias_ref:  (1, Cout)              folded bias = (conv_b - mean)*scale + beta
    o_ref:     (bhc//pool, Wo, Cout)  pooled output rows of this block
    y_scr:     (bhc//pool, wc_eff, Cout) f32 scratch for the W-direction pooling
    """
    rb = pl.program_id(1)
    row0 = rb * bhc                            # first conv-output row of this block
    tm = bhc * wc_eff
    cout = o_ref.shape[-1]
    bph = bhc // pool
    wo = wc_eff // pool

    # Conv as a kh*kw tap reduction over shifted windows of the resident image.
    # K = Cin per tap underfills the MXU systolic depth, but at these shapes the
    # kernel is HBM/VPU bound, and every tap read is VMEM traffic, not HBM.
    acc = jnp.zeros((tm, cout), jnp.float32)
    for t in range(kh * kw):
        dy, dx = divmod(t, kw)
        win = x_ref[pl.ds(row0 + dy, bhc), pl.ds(dx, wc_eff), :]   # (bhc, wc_eff, Cin)
        acc = acc + jnp.dot(win.reshape(tm, cin), w_ref[t],
                            preferred_element_type=jnp.float32)

    # Folded BatchNorm (eval-mode) affine + ReLU in f32 on the VPU.
    y = jnp.maximum(acc * scale_ref[...] + bias_ref[...], 0.0)

    # MaxPool(pool x pool).  H direction first: that axis is tile-major, so the
    # pairwise max needs no relayout (free reshape when wc_eff % 8 == 0).
    y4 = y.reshape(bph, pool, wc_eff, cout)
    yh = y4[:, 0]
    for ty in range(1, pool):
        yh = jnp.maximum(yh, y4[:, ty])

    # W direction: stage in VMEM, then combine `pool` strided sub-grids.
    y_scr[...] = yh
    r = y_scr[:, pl.ds(0, wo, stride=pool), :]
    for tx in range(1, pool):
        r = jnp.maximum(r, y_scr[:, pl.ds(tx, wo, stride=pool), :])

    o_ref[...] = r.astype(o_ref.dtype)


def conv_block_forward(x_nchw, w_oihw, conv_b, gamma, beta, run_mean, run_var,
                       *, pool=2, eps=1e-5, operand_dtype=jnp.bfloat16):
    """ConvBlock forward (inference). Input/output in NCHW, like PyTorch."""
    n, cin, h, w = x_nchw.shape
    cout, cin_w, kh, kw = w_oihw.shape
    assert cin_w == cin
    pad = 1                                    # nn.Conv2d(..., padding=1)

    hc = h + 2 * pad - kh + 1                  # conv output spatial dims
    wc = w + 2 * pad - kw + 1
    ho, wo = hc // pool, wc // pool            # nn.MaxPool2d floors (truncates)
    assert ho >= 1 and wo >= 1, "pooled output must be non-empty"
    hc_eff, wc_eff = ho * pool, wo * pool      # conv rows/cols that survive pooling
    hp, wp = h + 2 * pad, w + 2 * pad

    # ---- HBM-side prep: ~1x input read, no im2col slab ----------------------
    x_pad = jnp.pad(jnp.transpose(x_nchw, (0, 2, 3, 1)),
                    ((0, 0), (pad, pad), (pad, pad), (0, 0))).astype(operand_dtype)
    w_taps = jnp.transpose(w_oihw, (2, 3, 1, 0)).reshape(
        kh * kw, cin, cout).astype(operand_dtype)
    scale = (gamma / jnp.sqrt(run_var + eps)).astype(jnp.float32)
    bias = ((conv_b - run_mean) * scale + beta).astype(jnp.float32)
    scale2d = scale.reshape(1, cout)
    bias2d = bias.reshape(1, cout)

    # ---- pick conv-rows-per-step from a per-generation VMEM budget ----------
    budget = _vmem_budget_bytes()
    item = jnp.dtype(operand_dtype).itemsize

    def est(rows):
        tm = rows * wc_eff
        fixed = (2 * _vmem_bytes((hp, wp, cin), operand_dtype)        # image (dbl-buffered)
                 + _vmem_bytes((kh * kw, cin, cout), operand_dtype)   # weight taps
                 + 2 * _vmem_bytes((1, cout), jnp.float32))           # scale + bias
        step = (2 * _vmem_bytes((rows // pool, wc_eff // pool, cout), jnp.float32)
                + _vmem_bytes((rows // pool, wc_eff, cout), jnp.float32)   # y_scr
                + tm * 128 * 4 * 2                                    # acc + y f32 temps
                + tm * 128 * item)                                    # per-tap lhs temp
        return fixed + step

    cands = [r for r in range(hc_eff, 0, -pool) if hc_eff % r == 0] or [hc_eff]
    fitting = [r for r in cands if est(r) <= budget] or [cands[-1]]
    min_steps = 4        # >=2 so both v7x TensorCores work; a few more to pipeline
    bhc = max(fitting, key=lambda r: (min(n * (hc_eff // r), min_steps), r))
    rb_count = hc_eff // bhc
    bph = bhc // pool

    vmem_kwargs = {}
    need = 2 * est(bhc)
    if need > 32 * 2 ** 20:                    # only raise the limit when required
        vmem_kwargs["vmem_limit_bytes"] = int(min(60 * 2 ** 20, need))

    kernel = functools.partial(_convblock_kernel, kh=kh, kw=kw, cin=cin,
                               bhc=bhc, wc_eff=wc_eff, pool=pool)

    out_nhwc = pl.pallas_call(
        kernel,
        out_shape=jax.ShapeDtypeStruct((n, ho, wo, cout), jnp.float32),
        grid=(n, rb_count),
        in_specs=[
            # Whole padded image of batch b; the block index is constant across
            # the row-block axis, so it is DMA'd from HBM exactly once per image.
            pl.BlockSpec((None, hp, wp, cin), lambda b, r: (b, 0, 0, 0)),
            _const_block_spec((kh * kw, cin, cout), lambda b, r: (0, 0, 0)),
            _const_block_spec((1, cout), lambda b, r: (0, 0)),
            _const_block_spec((1, cout), lambda b, r: (0, 0)),
        ],
        out_specs=pl.BlockSpec((None, bph, wo, cout), lambda b, r: (b, r, 0, 0)),
        scratch_shapes=[pltpu.VMEM((bph, wc_eff, cout), jnp.float32)],
        compiler_params=pltpu.CompilerParams(
            dimension_semantics=("parallel", "arbitrary"), **vmem_kwargs),
    )(x_pad, w_taps, scale2d, bias2d)

    # Dropout2d in inference mode is identity.
    return jnp.transpose(out_nhwc, (0, 3, 1, 2))               # NCHW


def _reference(x_nchw, w_oihw, conv_b, gamma, beta, run_mean, run_var,
               *, pool=2, eps=1e-5):
    """Pure-JAX reference for correctness checking."""
    y = jax.lax.conv_general_dilated(
        x_nchw, w_oihw, window_strides=(1, 1), padding=((1, 1), (1, 1)),
        dimension_numbers=("NCHW", "OIHW", "NCHW"))
    y = y + conv_b[None, :, None, None]
    y = (y - run_mean[None, :, None, None]) / jnp.sqrt(
        run_var[None, :, None, None] + eps)
    y = y * gamma[None, :, None, None] + beta[None, :, None, None]
    y = jnp.maximum(y, 0.0)
    y = jax.lax.reduce_window(
        y, -jnp.inf, jax.lax.max,
        window_dimensions=(1, 1, pool, pool),
        window_strides=(1, 1, pool, pool), padding="VALID")
    return y


if __name__ == "__main__":
    # Small shapes consistent with the module: batch=2, Cin=4, H=W=16,
    # Cout=8, kernel_size=3, max_pool=2.
    N, CIN, H, W = 2, 4, 16, 16
    COUT, K, POOL = 8, 3, 2

    key = jax.random.PRNGKey(0)
    kx, kw_, kb, kg, kbe, km, kv = jax.random.split(key, 7)

    x = jax.random.normal(kx, (N, CIN, H, W), dtype=jnp.float32)
    w = jax.random.normal(kw_, (COUT, CIN, K, K), dtype=jnp.float32) * 0.1
    conv_b = jax.random.normal(kb, (COUT,), dtype=jnp.float32) * 0.1
    gamma = 1.0 + 0.1 * jax.random.normal(kg, (COUT,), dtype=jnp.float32)
    beta = 0.1 * jax.random.normal(kbe, (COUT,), dtype=jnp.float32)
    run_mean = 0.1 * jax.random.normal(km, (COUT,), dtype=jnp.float32)
    run_var = 1.0 + 0.1 * jax.random.uniform(kv, (COUT,), dtype=jnp.float32)

    ref = _reference(x, w, conv_b, gamma, beta, run_mean, run_var, pool=POOL)

    # f32 MXU operands: tight tolerance.
    out_f32 = conv_block_forward(x, w, conv_b, gamma, beta, run_mean, run_var,
                                 pool=POOL, operand_dtype=jnp.float32)
    out_f32 = jax.block_until_ready(out_f32)
    assert out_f32.shape == (N, COUT, H // POOL, W // POOL), out_f32.shape
    assert jnp.allclose(out_f32, ref, atol=1e-4, rtol=1e-4), "f32 mismatch"

    # bf16 MXU operands (recommended fast path): looser tolerance.
    out_bf16 = conv_block_forward(x, w, conv_b, gamma, beta, run_mean, run_var,
                                  pool=POOL, operand_dtype=jnp.bfloat16)
    out_bf16 = jax.block_until_ready(out_bf16)
    assert out_bf16.shape == (N, COUT, H // POOL, W // POOL), out_bf16.shape
    assert jnp.allclose(out_bf16, ref, atol=5e-2, rtol=5e-2), "bf16 mismatch"

    print("KERNEL_OK")
</pallas_src>

<mosaic_0001>
module attributes {stable_mosaic.version = 11 : i64} {
  func.func @_convblock_kernel(%arg0: i32, %arg1: i32, %arg2: memref<1x18x18x4xf32, #tpu.memory_space<vmem>>, %arg3: memref<9x4x8xf32, #tpu.memory_space<vmem>>, %arg4: memref<1x8xf32, #tpu.memory_space<vmem>>, %arg5: memref<1x8xf32, #tpu.memory_space<vmem>>, %arg6: memref<1x4x8x8xf32, #tpu.memory_space<vmem>>, %arg7: memref<4x16x8xf32, #tpu.memory_space<vmem>>) attributes {dimension_semantics = [#tpu.dimension_semantics<parallel>, #tpu.dimension_semantics<arbitrary>], iteration_bounds = array<i64: 2, 2>, scalar_prefetch = 0 : i64, scratch_operands = 1 : i64, tpu.core_type = #tpu.core_type<tc>, window_params = [{transform_indices = @transform_0, window_bounds = array<i64: 1, 18, 18, 4>}, {pipeline_mode = #tpu.pipeline_mode<synchronous>, transform_indices = @transform_1, window_bounds = array<i64: 9, 4, 8>}, {pipeline_mode = #tpu.pipeline_mode<synchronous>, transform_indices = @transform_2, window_bounds = array<i64: 1, 8>}, {pipeline_mode = #tpu.pipeline_mode<synchronous>, transform_indices = @transform_3, window_bounds = array<i64: 1, 8>}, {transform_indices = @transform_4, window_bounds = array<i64: 1, 4, 8, 8>}]} {
    %c8_i32 = arith.constant 8 : i32
    %0 = arith.muli %arg1, %c8_i32 : i32
    %cst = arith.constant 0.000000e+00 : f32
    %1 = vector.broadcast %cst : f32 to vector<128x8xf32>
    %c0_i32 = arith.constant 0 : i32
    %2 = arith.addi %0, %c0_i32 : i32
    %c0 = arith.constant 0 : index
    %3 = arith.index_cast %2 : i32 to index
    %c0_0 = arith.constant 0 : index
    %c0_1 = arith.constant 0 : index
    %4 = vector.load %arg2[%c0, %3, %c0_0, %c0_1] : memref<1x18x18x4xf32, #tpu.memory_space<vmem>>, vector<1x8x16x4xf32>
    %5 = vector.shape_cast %4 : vector<1x8x16x4xf32> to vector<8x16x4xf32>
    %6 = vector.shape_cast %5 : vector<8x16x4xf32> to vector<128x4xf32>
    %c0_2 = arith.constant 0 : index
    %c0_3 = arith.constant 0 : index
    %c0_4 = arith.constant 0 : index
    %7 = vector.load %arg3[%c0_2, %c0_3, %c0_4] : memref<9x4x8xf32, #tpu.memory_space<vmem>>, vector<1x4x8xf32>
    %8 = vector.shape_cast %7 : vector<1x4x8xf32> to vector<4x8xf32>
    %cst_5 = arith.constant dense<0.000000e+00> : vector<128x8xf32>
    %9 = tpu.matmul %6, %8, %cst_5 {dimension_numbers = #tpu.dot_dimension_numbers<[1], [0], [0], [1], [0, 0, 1, 1], [], []>} : vector<128x4xf32>, vector<4x8xf32>, vector<128x8xf32> -> vector<128x8xf32>
    %10 = arith.addf %1, %9 : vector<128x8xf32>
    %c0_i32_6 = arith.constant 0 : i32
    %11 = arith.addi %0, %c0_i32_6 : i32
    %c0_7 = arith.constant 0 : index
    %12 = arith.index_cast %11 : i32 to index
    %c1 = arith.constant 1 : index
    %c0_8 = arith.constant 0 : index
    %13 = vector.load %arg2[%c0_7, %12, %c1, %c0_8] : memref<1x18x18x4xf32, #tpu.memory_space<vmem>>, vector<1x8x16x4xf32>
    %14 = vector.shape_cast %13 : vector<1x8x16x4xf32> to vector<8x16x4xf32>
    %15 = vector.shape_cast %14 : vector<8x16x4xf32> to vector<128x4xf32>
    %c1_9 = arith.constant 1 : index
    %c0_10 = arith.constant 0 : index
    %c0_11 = arith.constant 0 : index
    %16 = vector.load %arg3[%c1_9, %c0_10, %c0_11] : memref<9x4x8xf32, #tpu.memory_space<vmem>>, vector<1x4x8xf32>
    %17 = vector.shape_cast %16 : vector<1x4x8xf32> to vector<4x8xf32>
    %cst_12 = arith.constant dense<0.000000e+00> : vector<128x8xf32>
    %18 = tpu.matmul %15, %17, %cst_12 {dimension_numbers = #tpu.dot_dimension_numbers<[1], [0], [0], [1], [0, 0, 1, 1], [], []>} : vector<128x4xf32>, vector<4x8xf32>, vector<128x8xf32> -> vector<128x8xf32>
    %19 = arith.addf %10, %18 : vector<128x8xf32>
    %c0_i32_13 = arith.constant 0 : i32
    %20 = arith.addi %0, %c0_i32_13 : i32
    %c0_14 = arith.constant 0 : index
    %21 = arith.index_cast %20 : i32 to index
    %c2 = arith.constant 2 : index
    %c0_15 = arith.constant 0 : index
    %22 = vector.load %arg2[%c0_14, %21, %c2, %c0_15] : memref<1x18x18x4xf32, #tpu.memory_space<vmem>>, vector<1x8x16x4xf32>
    %23 = vector.shape_cast %22 : vector<1x8x16x4xf32> to vector<8x16x4xf32>
    %24 = vector.shape_cast %23 : vector<8x16x4xf32> to vector<128x4xf32>
    %c2_16 = arith.constant 2 : index
    %c0_17 = arith.constant 0 : index
    %c0_18 = arith.constant 0 : index
    %25 = vector.load %arg3[%c2_16, %c0_17, %c0_18] : memref<9x4x8xf32, #tpu.memory_space<vmem>>, vector<1x4x8xf32>
    %26 = vector.shape_cast %25 : vector<1x4x8xf32> to vector<4x8xf32>
    %cst_19 = arith.constant dense<0.000000e+00> : vector<128x8xf32>
    %27 = tpu.matmul %24, %26, %cst_19 {dimension_numbers = #tpu.dot_dimension_numbers<[1], [0], [0], [1], [0, 0, 1, 1], [], []>} : vector<128x4xf32>, vector<4x8xf32>, vector<128x8xf32> -> vector<128x8xf32>
    %28 = arith.addf %19, %27 : vector<128x8xf32>
    %c1_i32 = arith.constant 1 : i32
    %29 = arith.addi %0, %c1_i32 : i32
    %c0_20 = arith.constant 0 : index
    %30 = arith.index_cast %29 : i32 to index
    %c0_21 = arith.constant 0 : index
    %c0_22 = arith.constant 0 : index
    %31 = vector.load %arg2[%c0_20, %30, %c0_21, %c0_22] : memref<1x18x18x4xf32, #tpu.memory_space<vmem>>, vector<1x8x16x4xf32>
    %32 = vector.shape_cast %31 : vector<1x8x16x4xf32> to vector<8x16x4xf32>
    %33 = vector.shape_cast %32 : vector<8x16x4xf32> to vector<128x4xf32>
    %c3 = arith.constant 3 : index
    %c0_23 = arith.constant 0 : index
    %c0_24 = arith.constant 0 : index
    %34 = vector.load %arg3[%c3, %c0_23, %c0_24] : memref<9x4x8xf32, #tpu.memory_space<vmem>>, vector<1x4x8xf32>
    %35 = vector.shape_cast %34 : vector<1x4x8xf32> to vector<4x8xf32>
    %cst_25 = arith.constant dense<0.000000e+00> : vector<128x8xf32>
    %36 = tpu.matmul %33, %35, %cst_25 {dimension_numbers = #tpu.dot_dimension_numbers<[1], [0], [0], [1], [0, 0, 1, 1], [], []>} : vector<128x4xf32>, vector<4x8xf32>, vector<128x8xf32> -> vector<128x8xf32>
    %37 = arith.addf %28, %36 : vector<128x8xf32>
    %c1_i32_26 = arith.constant 1 : i32
    %38 = arith.addi %0, %c1_i32_26 : i32
    %c0_27 = arith.constant 0 : index
    %39 = arith.index_cast %38 : i32 to index
    %c1_28 = arith.constant 1 : index
    %c0_29 = arith.constant 0 : index
    %40 = vector.load %arg2[%c0_27, %39, %c1_28, %c0_29] : memref<1x18x18x4xf32, #tpu.memory_space<vmem>>, vector<1x8x16x4xf32>
    %41 = vector.shape_cast %40 : vector<1x8x16x4xf32> to vector<8x16x4xf32>
    %42 = vector.shape_cast %41 : vector<8x16x4xf32> to vector<128x4xf32>
    %c4 = arith.constant 4 : index
    %c0_30 = arith.constant 0 : index
    %c0_31 = arith.constant 0 : index
    %43 = vector.load %arg3[%c4, %c0_30, %c0_31] : memref<9x4x8xf32, #tpu.memory_space<vmem>>, vector<1x4x8xf32>
    %44 = vector.shape_cast %43 : vector<1x4x8xf32> to vector<4x8xf32>
    %cst_32 = arith.constant dense<0.000000e+00> : vector<128x8xf32>
    %45 = tpu.matmul %42, %44, %cst_32 {dimension_numbers = #tpu.dot_dimension_numbers<[1], [0], [0], [1], [0, 0, 1, 1], [], []>} : vector<128x4xf32>, vector<4x8xf32>, vector<128x8xf32> -> vector<128x8xf32>
    %46 = arith.addf %37, %45 : vector<128x8xf32>
    %c1_i32_33 = arith.constant 1 : i32
    %47 = arith.addi %0, %c1_i32_33 : i32
    %c0_34 = arith.constant 0 : index
    %48 = arith.index_cast %47 : i32 to index
    %c2_35 = arith.constant 2 : index
    %c0_36 = arith.constant 0 : index
    %49 = vector.load %arg2[%c0_34, %48, %c2_35, %c0_36] : memref<1x18x18x4xf32, #tpu.memory_space<vmem>>, vector<1x8x16x4xf32>
    %50 = vector.shape_cast %49 : vector<1x8x16x4xf32> to vector<8x16x4xf32>
    %51 = vector.shape_cast %50 : vector<8x16x4xf32> to vector<128x4xf32>
    %c5 = arith.constant 5 : index
    %c0_37 = arith.constant 0 : index
    %c0_38 = arith.constant 0 : index
    %52 = vector.load %arg3[%c5, %c0_37, %c0_38] : memref<9x4x8xf32, #tpu.memory_space<vmem>>, vector<1x4x8xf32>
    %53 = vector.shape_cast %52 : vector<1x4x8xf32> to vector<4x8xf32>
    %cst_39 = arith.constant dense<0.000000e+00> : vector<128x8xf32>
    %54 = tpu.matmul %51, %53, %cst_39 {dimension_numbers = #tpu.dot_dimension_numbers<[1], [0], [0], [1], [0, 0, 1, 1], [], []>} : vector<128x4xf32>, vector<4x8xf32>, vector<128x8xf32> -> vector<128x8xf32>
    %55 = arith.addf %46, %54 : vector<128x8xf32>
    %c2_i32 = arith.constant 2 : i32
    %56 = arith.addi %0, %c2_i32 : i32
    %c0_40 = arith.constant 0 : index
    %57 = arith.index_cast %56 : i32 to index
    %c0_41 = arith.constant 0 : index
    %c0_42 = arith.constant 0 : index
    %58 = vector.load %arg2[%c0_40, %57, %c0_41, %c0_42] : memref<1x18x18x4xf32, #tpu.memory_space<vmem>>, vector<1x8x16x4xf32>
    %59 = vector.shape_cast %58 : vector<1x8x16x4xf32> to vector<8x16x4xf32>
    %60 = vector.shape_cast %59 : vector<8x16x4xf32> to vector<128x4xf32>
    %c6 = arith.constant 6 : index
    %c0_43 = arith.constant 0 : index
    %c0_44 = arith.constant 0 : index
    %61 = vector.load %arg3[%c6, %c0_43, %c0_44] : memref<9x4x8xf32, #tpu.memory_space<vmem>>, vector<1x4x8xf32>
    %62 = vector.shape_cast %61 : vector<1x4x8xf32> to vector<4x8xf32>
    %cst_45 = arith.constant dense<0.000000e+00> : vector<128x8xf32>
    %63 = tpu.matmul %60, %62, %cst_45 {dimension_numbers = #tpu.dot_dimension_numbers<[1], [0], [0], [1], [0, 0, 1, 1], [], []>} : vector<128x4xf32>, vector<4x8xf32>, vector<128x8xf32> -> vector<128x8xf32>
    %64 = arith.addf %55, %63 : vector<128x8xf32>
    %c2_i32_46 = arith.constant 2 : i32
    %65 = arith.addi %0, %c2_i32_46 : i32
    %c0_47 = arith.constant 0 : index
    %66 = arith.index_cast %65 : i32 to index
    %c1_48 = arith.constant 1 : index
    %c0_49 = arith.constant 0 : index
    %67 = vector.load %arg2[%c0_47, %66, %c1_48, %c0_49] : memref<1x18x18x4xf32, #tpu.memory_space<vmem>>, vector<1x8x16x4xf32>
    %68 = vector.shape_cast %67 : vector<1x8x16x4xf32> to vector<8x16x4xf32>
    %69 = vector.shape_cast %68 : vector<8x16x4xf32> to vector<128x4xf32>
    %c7 = arith.constant 7 : index
    %c0_50 = arith.constant 0 : index
    %c0_51 = arith.constant 0 : index
    %70 = vector.load %arg3[%c7, %c0_50, %c0_51] : memref<9x4x8xf32, #tpu.memory_space<vmem>>, vector<1x4x8xf32>
    %71 = vector.shape_cast %70 : vector<1x4x8xf32> to vector<4x8xf32>
    %cst_52 = arith.constant dense<0.000000e+00> : vector<128x8xf32>
    %72 = tpu.matmul %69, %71, %cst_52 {dimension_numbers = #tpu.dot_dimension_numbers<[1], [0], [0], [1], [0, 0, 1, 1], [], []>} : vector<128x4xf32>, vector<4x8xf32>, vector<128x8xf32> -> vector<128x8xf32>
    %73 = arith.addf %64, %72 : vector<128x8xf32>
    %c2_i32_53 = arith.constant 2 : i32
    %74 = arith.addi %0, %c2_i32_53 : i32
    %c0_54 = arith.constant 0 : index
    %75 = arith.index_cast %74 : i32 to index
    %c2_55 = arith.constant 2 : index
    %c0_56 = arith.constant 0 : index
    %76 = vector.load %arg2[%c0_54, %75, %c2_55, %c0_56] : memref<1x18x18x4xf32, #tpu.memory_space<vmem>>, vector<1x8x16x4xf32>
    %77 = vector.shape_cast %76 : vector<1x8x16x4xf32> to vector<8x16x4xf32>
    %78 = vector.shape_cast %77 : vector<8x16x4xf32> to vector<128x4xf32>
    %c8 = arith.constant 8 : index
    %c0_57 = arith.constant 0 : index
    %c0_58 = arith.constant 0 : index
    %79 = vector.load %arg3[%c8, %c0_57, %c0_58] : memref<9x4x8xf32, #tpu.memory_space<vmem>>, vector<1x4x8xf32>
    %80 = vector.shape_cast %79 : vector<1x4x8xf32> to vector<4x8xf32>
    %cst_59 = arith.constant dense<0.000000e+00> : vector<128x8xf32>
    %81 = tpu.matmul %78, %80, %cst_59 {dimension_numbers = #tpu.dot_dimension_numbers<[1], [0], [0], [1], [0, 0, 1, 1], [], []>} : vector<128x4xf32>, vector<4x8xf32>, vector<128x8xf32> -> vector<128x8xf32>
    %82 = arith.addf %73, %81 : vector<128x8xf32>
    %c0_60 = arith.constant 0 : index
    %c0_61 = arith.constant 0 : index
    %83 = vector.load %arg4[%c0_60, %c0_61] : memref<1x8xf32, #tpu.memory_space<vmem>>, vector<1x8xf32>
    %84 = vector.broadcast %83 : vector<1x8xf32> to vector<128x8xf32>
    %85 = arith.mulf %82, %84 : vector<128x8xf32>
    %c0_62 = arith.constant 0 : index
    %c0_63 = arith.constant 0 : index
    %86 = vector.load %arg5[%c0_62, %c0_63] : memref<1x8xf32, #tpu.memory_space<vmem>>, vector<1x8xf32>
    %87 = vector.broadcast %86 : vector<1x8xf32> to vector<128x8xf32>
    %88 = arith.addf %85, %87 : vector<128x8xf32>
    %cst_64 = arith.constant 0.000000e+00 : f32
    %89 = vector.broadcast %cst_64 : f32 to vector<128x8xf32>
    %90 = arith.maximumf %88, %89 : vector<128x8xf32>
    %91 = vector.shape_cast %90 : vector<128x8xf32> to vector<4x2x16x8xf32>
    %92 = vector.extract_strided_slice %91 {offsets = [0, 0, 0, 0], sizes = [4, 1, 16, 8], strides = [1, 1, 1, 1]} : vector<4x2x16x8xf32> to vector<4x1x16x8xf32>
    %93 = vector.shape_cast %92 : vector<4x1x16x8xf32> to vector<4x16x8xf32>
    %94 = vector.extract_strided_slice %91 {offsets = [0, 1, 0, 0], sizes = [4, 1, 16, 8], strides = [1, 1, 1, 1]} : vector<4x2x16x8xf32> to vector<4x1x16x8xf32>
    %95 = vector.shape_cast %94 : vector<4x1x16x8xf32> to vector<4x16x8xf32>
    %96 = arith.maximumf %93, %95 : vector<4x16x8xf32>
    %c0_65 = arith.constant 0 : index
    %c0_66 = arith.constant 0 : index
    %c0_67 = arith.constant 0 : index
    %97 = vector.load %arg7[%c0_65, %c0_66, %c0_67] : memref<4x16x8xf32, #tpu.memory_space<vmem>>, vector<4x16x8xf32>
    tpu.vector_store %arg7[%c0_65, %c0_66, %c0_67], %96 {strides = array<i32>} : memref<4x16x8xf32, #tpu.memory_space<vmem>>, vector<4x16x8xf32>,
    %c0_68 = arith.constant 0 : index
    %c0_69 = arith.constant 0 : index
    %c0_70 = arith.constant 0 : index
    %98 = tpu.strided_load %arg7[%c0_68, %c0_69, %c0_70] {strides = array<i32: 1, 2, 1>} : memref<4x16x8xf32, #tpu.memory_space<vmem>>, vector<4x8x8xf32>
    %c0_71 = arith.constant 0 : index
    %c1_72 = arith.constant 1 : index
    %c0_73 = arith.constant 0 : index
    %99 = tpu.strided_load %arg7[%c0_71, %c1_72, %c0_73] {strides = array<i32: 1, 2, 1>} : memref<4x16x8xf32, #tpu.memory_space<vmem>>, vector<4x8x8xf32>
    %100 = arith.maximumf %98, %99 : vector<4x8x8xf32>
    %c0_74 = arith.constant 0 : index
    %c0_75 = arith.constant 0 : index
    %c0_76 = arith.constant 0 : index
    %c0_77 = arith.constant 0 : index
    %101 = vector.load %arg6[%c0_74, %c0_75, %c0_76, %c0_77] : memref<1x4x8x8xf32, #tpu.memory_space<vmem>>, vector<1x4x8x8xf32>
    %102 = vector.shape_cast %101 : vector<1x4x8x8xf32> to vector<4x8x8xf32>
    %103 = vector.shape_cast %100 : vector<4x8x8xf32> to vector<1x4x8x8xf32>
    tpu.vector_store %arg6[%c0_74, %c0_75, %c0_76, %c0_77], %103 {strides = array<i32>} : memref<1x4x8x8xf32, #tpu.memory_space<vmem>>, vector<1x4x8x8xf32>,
    return
  }
  func.func @transform_0(%arg0: i32, %arg1: i32) -> (i32, i32, i32, i32) {
    %c0_i32 = arith.constant 0 : i32
    %c0_i32_0 = arith.constant 0 : i32
    %c0_i32_1 = arith.constant 0 : i32
    %c0_i32_2 = arith.constant 0 : i32
    return %arg0, %c0_i32, %c0_i32_0, %c0_i32_1 : i32, i32, i32, i32
  }
  func.func @transform_1(%arg0: i32, %arg1: i32) -> (i32, i32, i32) {
    %c0_i32 = arith.constant 0 : i32
    %c0_i32_0 = arith.constant 0 : i32
    %c0_i32_1 = arith.constant 0 : i32
    %c0_i32_2 = arith.constant 0 : i32
    return %c0_i32, %c0_i32_0, %c0_i32_1 : i32, i32, i32
  }
  func.func @transform_2(%arg0: i32, %arg1: i32) -> (i32, i32) {
    %c0_i32 = arith.constant 0 : i32
    %c0_i32_0 = arith.constant 0 : i32
    %c0_i32_1 = arith.constant 0 : i32
    return %c0_i32, %c0_i32_0 : i32, i32
  }
  func.func @transform_3(%arg0: i32, %arg1: i32) -> (i32, i32) {
    %c0_i32 = arith.constant 0 : i32
    %c0_i32_0 = arith.constant 0 : i32
    %c0_i32_1 = arith.constant 0 : i32
    return %c0_i32, %c0_i32_0 : i32, i32
  }
  func.func @transform_4(%arg0: i32, %arg1: i32) -> (i32, i32, i32, i32) {
    %c0_i32 = arith.constant 0 : i32
    %c0_i32_0 = arith.constant 0 : i32
    %c0_i32_1 = arith.constant 0 : i32
    return %arg0, %arg1, %c0_i32, %c0_i32_0 : i32, i32, i32, i32
  }
}

</mosaic_0001>

<bundles_post_ra>
// kernel: tpu_custom_call.1
= control target key start
LH: loop header
LB: loop body
LE: loop exit
PB: predicated region body
PF: predicated region fallthrough
CT: control target
= control target key end

     0   :  { %9 = vsyncpa [#allocation4], 0  ;;  %s4135_s0 = inlined_call_operand.vmem [shape: f32[2,18,18,4], index: 0, kind: input, shape index: {}]   ;;  %s4136_s1 = inlined_call_operand.vmem [shape: f32[9,4,8], index: 1, kind: input, shape index: {}]   ;;  %s4137_s2 = inlined_call_operand.vmem [shape: f32[1,8], index: 2, kind: input, shape index: {}]   ;;  %s4138_s3 = inlined_call_operand.vmem [shape: f32[1,8], index: 3, kind: input, shape index: {}]   ;;  %s4139_s4 = inlined_call_operand.hbm [shape: f32[2,8,8,8], index: 4, kind: output, shape index: {}]  }
   0x1   :  { %11 = vsyncpa [#allocation4 + $0x1], 0  ;;  %s3456_s15 = smov 0   ;;  %s3458_s16 = smov 0  }
   0x2   :  { %s3460_s17 = smov 0   ;;  %s3462_s18 = smov 0  }
   0x3   :  { %s3464_s19 = smov 0   ;;  %s3466_s20 = smov 0  }
   0x4   :  { %s3468_s21 = smov 0   ;;  %s3470_s22 = smov 0  }
   0x5 LB: > { %s2463_s23 = sadd.s32 4294967295, %s3426_s22   ;;  %s2464_s24 = sadd.s32 4294967294, %s3426_s22   ;;  %s3426_s22 = sphi %s3470_s22, %s17_s22   ;;  %s3422_s21 = sphi %s3468_s21, %s4148_s21   ;;  %s3418_s20 = sphi %s3466_s20, %s4147_s20   ;;  %s3414_s19 = sphi %s3464_s19, %s4146_s19   ;;  %s3410_s18 = sphi %s3462_s18, %s4145_s18   ;;  %s3406_s17 = sphi %s3460_s17, %s4144_s17   ;;  %s3402_s16 = sphi %s3458_s16, %s4143_s16   ;;  %s3398_s15 = sphi %s3456_s15, %s4142_s15  }
   0x6   : > { %s26_s25 = sadd.s32 1, %s3418_s20  ;;  %s29_s26 = sadd.s32 1, %s3422_s21 }
   0x7   : > { %p27_p0 = scmp.ge.s32.totalorder %s26_s25, 2  ;;  %p137_p1 = scmp.ne.s32.totalorder %s3406_s17, %s3402_s16 }
   0x8   : > { %p138_p2 = scmp.eq.s32.totalorder %s2463_s23, 3  ;;  %p143_p5 = scmp.ne.s32.totalorder %s3402_s16, %s3398_s15 }
   0x9   : > { %s4150_s25 = smov (%p27_p0, %s26_s25), 0  ;;  %s4152_s26 = smov (!%p27_p0, %s29_s26), %s3422_s21 }
   0xa   : > { %s123_s27 = ssub.s32 %s3418_s20, %s4150_s25  ;;  %p3507_p3 = por %p138_p2, %p137_p1 }
   0xb   : > { %p31_p4 = scmp.ge.s32.totalorder %s4152_s26, 2  ;;  %p144_p6 = scmp.eq.s32.totalorder %s2464_s24, 3 }
   0xc   : > { %p2467_p7 = scmp.ge.s32.totalorder %s3426_s22, 1  ;;  %p179_p9 = scmp.lt.s32.totalorder %s3426_s22, 5 }
   0xd   : > { %s4154_s26 = smov (%p31_p4, %s4152_s26), 0  ;;  %p3516_p8 = por %p144_p6, %p143_p5 }
   0xe   : > { %s122_s30 = ssub.s32 %s3422_s21, %s4154_s26  ;;  %s127_s5 = sadd.s32 1, %s3406_s17 }
   0xf   : > { %s124_s6 = sor.u32 %s123_s27, %s122_s30  ;;  %p180_p10 = pnand %p2467_p7, %p179_p9 }
  0x10   : > { %p125_p11 = scmp.eq.s32.totalorder %s124_s6, 0  ;;  %v2472_v0 = vld [vmem:[%s4136_s1 + $0x4] sm:$0xf] (!%p180_p10)  ;;  %vm298_vm0 = vcmask (!%p180_p10), 1043456   ;;  %v3533_v1 = vld [vmem:[%s4136_s1 + $0x10] sm:$0xf] (!%p180_p10) }
  0x11   : > { %183 = sbr.rel (%p180_p10) target bundleno = 420 (0x1a4), region = 36  ;;  %p205_p12 = scmp.lt.s32.totalorder (!%p180_p10), %s3414_s19, 1  ;;  %2894 = vmatprep.subr.msk.mxu1 (!%p180_p10), %vm298_vm0, %v2472_v0  ;;  %2998 = vmatprep.subr.msk.mxu0 (!%p180_p10), %vm298_vm0, %v3533_v1  ;;  %v230_v2 = vld [vmem:[%s4136_s1] sm:$0xf] (!%p180_p10)  ;;  %v2611_v3 = vld [vmem:[%s4136_s1 + $0x14] sm:$0xf] (!%p180_p10) }
  0x12   : > { %s3525_s7 = scalar_select %p125_p11, %s3406_s17, %s127_s5  }
  0x13   : > { %2895 = vmatpush3.msk.msra.mxu1 (!%p180_p10), %vm298_vm0, %v2472_v0  ;;  %2999 = vmatpush3.msk.msra.mxu0 (!%p180_p10), %vm298_vm0, %v3533_v1  ;;  %s2471_s27 = smul.u32 (!%p180_p10), 192, %s3410_s18  ;;  %vm249_vm1 = vcmask (!%p180_p10), 31744   ;;  %v2647_v9 = vld [vmem:[%s4136_s1 + $0x18] sm:$0xf] (!%p180_p10)  ;;  %v3574_v10 = vld [vmem:[%s4136_s1 + $0x8] sm:$0xf] (!%p180_p10) }
  0x14   : > { %2920 = vmatprep.subr.msk.mxu1 (!%p180_p10), %vm298_vm0, %v230_v2  ;;  %3024 = vmatprep.subr.msk.mxu0 (!%p180_p10), %vm298_vm0, %v2611_v3  ;;  %v3637_v20 = vld [vmem:[%s4136_s1 + $0x1c] sm:$0xf] (!%p180_p10)  ;;  %v2543_v37 = vld [vmem:[%s4136_s1 + $0xc] sm:$0xf] (!%p180_p10)  ;;  %v2715_v51 = vld [vmem:[%s4136_s1 + $0x20] sm:$0xf] (!%p180_p10) }
  0x15   : > { %vm2329_vm2 = vcmask (!%p180_p10), 64512   ;;  %s202_s11 = sand.u32 (!%p180_p10), 1, %s3402_s16   ;;  %s2736_s14 = sshll.u32 (!%p180_p10), %s3410_s18, 2 }
  0x16   : > { %s2468_s12 = sshll.u32 (!%p180_p10), %s202_s11, 5  ;;  %s2737_s23 = sshll.u32 (!%p180_p10), %s3414_s19, 3 }
  0x17   : > { %s4049_s13 = scalar_lea.vmem (!%p180_p10), [#allocation3], %s2468_s12  ;;  %s4083_s6 = scalar_lea.sflag (!%p180_p10), [#allocation4], %s202_s11 }
  0x18   : > { %s206_s24 = scalar_select %p205_p12, %s3414_s19, 1 }
  0x1a   : > { %s3258_s30 = smul.u32 432, %s206_s24  ;;  %s2374_s24 = sadd.s32 %s2737_s23, %s2736_s14 }
  0x1c   : > { %s209_s8 = scalar_lea.vmem %s4135_s0, %s3258_s30  ;;  %s2377_s30 = sshll.u32 %s4049_s13, 4  ;;  %s4077_s30 = int_to_ptr.vmem [resolvable:$true] %s2377_s30 }
  0x1d   : > { %s3555_s9 = scalar_lea.vmem %s209_s8, %s2471_s27  ;;  %s2738_s27 = sshll.u32 %s2374_s24, 7 }
  0x1e   : > { %v231_v4 = vld [vmem:[%s3555_s9 + $0x1] sm:$0xff]  ;;  %v2561_v5 = vld [vmem:[%s3555_s9 + $0x19] sm:$0xff]  ;;  %v232_v6 = vld [vmem:[%s3555_s9 + $0x9] sm:$0xff]  ;;  %s4075_s19 = scalar_lea.hbm %s4139_s4, %s2738_s27  ;;  %s3332_s8 = scalar_lea.vmem %s4077_s30, 512 }
  0x1f   : > { %2896 = vmatprep.mubr.msk.f32.mxu1 %vm249_vm1, %v231_v4  ;;  %3000 = vmatprep.mubr.msk.f32.mxu0 %vm249_vm1, %v2561_v5  ;;  %v2562_v7 = vld [vmem:[%s3555_s9 + $0x21] sm:$0xff]  ;;  %v3564_v8 = vld [vmem:[%s3555_s9 + $0x31] sm:$0xff]  ;;  %v3579_v11 = vld [vmem:[%s3555_s9 + $0x39] sm:$0xff]  ;;  %p3333_p13 = scmp.ne.s32.totalorder %s4077_s30, %s3332_s8 }
  0x20   : > { %2897 = vmatmul.mubr.msk.f32.vlgmr.msra.gmra.mrb[0].mxu1 %vm249_vm1, %v232_v6  ;;  %3001 = vmatmul.mubr.msk.f32.vlgmr.msra.gmra.mrb[0].mxu0 %vm249_vm1, %v2562_v7  ;;  %v3585_v12 = vld [vmem:[%s3555_s9 + $0x49] sm:$0xff]  ;;  %v3598_v13 = vld [vmem:[%s3555_s9 + $0x51] sm:$0xff]  ;;  %v3601_v14 = vld [vmem:[%s3555_s9 + $0x61] sm:$0xff] }
  0x21   : > { %2921 = vmatpush3.msk.msra.mxu1 %vm298_vm0, %v230_v2  ;;  %3025 = vmatpush3.msk.msra.mxu0 %vm298_vm0, %v2611_v3  ;;  %v3612_v15 = vld [vmem:[%s3555_s9 + $0x69] sm:$0xff]  ;;  %v3615_v16 = vld [vmem:[%s3555_s9 + $0x1a] sm:$0xff]  ;;  %v3632_v19 = vld [vmem:[%s3555_s9 + $0x32] sm:$0xff]  ;;  %p3334_p0 = pnand %p3333_p13, %p3507_p3 }
  0x22   : > { %2899 = vmatprep.mubr.msk.f32.mxu1 %vm249_vm1, %v2561_v5  ;;  %3003 = vmatprep.mubr.msk.f32.mxu0 %vm249_vm1, %v3564_v8  ;;  %v3626_v17 = vld [vmem:[%s3555_s9 + $0x22] sm:$0xff]  ;;  %v3629_v18 = vld [vmem:[%s3555_s9 + $0x79] sm:$0xff]  ;;  %v3655_v23 = vld [vmem:[%s3555_s9 + $0x91] sm:$0xff] }
  0x23   : > { %3050 = vmatprep.subr.msk.mxu0 %vm298_vm0, %v2647_v9  ;;  %2946 = vmatprep.subr.msk.mxu1 %vm298_vm0, %v3574_v10  ;;  %v3647_v21 = vld [vmem:[%s3555_s9 + $0x81] sm:$0xff]  ;;  %v3658_v24 = vld [vmem:[%s3555_s9 + $0x4a] sm:$0xff]  ;;  %v3671_v25 = vld [vmem:[%s3555_s9 + $0x99] sm:$0xff]  ;;  %p3335_p1 = pneg %p3334_p0 }
  0x24   : > { %2900 = vmatmul.mubr.msk.f32.gmra.mrb[2].mxu1 %vm249_vm1, %v2562_v7  ;;  %3004 = vmatmul.mubr.msk.f32.gmra.mrb[2].mxu0 %vm249_vm1, %v3579_v11  ;;  %v3650_v22 = vld [vmem:[%s3555_s9 + $0x3a] sm:$0xff]  ;;  %v3674_v26 = vld [vmem:[%s3555_s9 + $0x52] sm:$0xff]  ;;  %v3677_v27 = vld [vmem:[%s3555_s9 + $0xa9] sm:$0xff] }
  0x25   : > { %2902 = vmatprep.mubr.msk.f32.mxu1 %vm249_vm1, %v3564_v8  ;;  %3006 = vmatprep.mubr.msk.f32.mxu0 %vm249_vm1, %v3585_v12  ;;  %v3680_v28 = vld [vmem:[%s3555_s9 + $0x62] sm:$0xff]  ;;  %v3691_v29 = vld [vmem:[%s3555_s9 + $0xb1] sm:$0xff]  ;;  %v3698_v32 = vld [vmem:[%s3555_s9 + $0x7a] sm:$0xff] }
  0x26   : > { %v3694_v30 = vld [vmem:[%s3555_s9 + $0x6a] sm:$0xff]  ;;  %v214_v31 = vld [vmem:[%s3555_s9] sm:$0xff]  ;;  %v3712_v35 = vld [vmem:[%s3555_s9 + $0x18] sm:$0xff] }
  0x27   : > { %v215_v33 = vld [vmem:[%s3555_s9 + $0x8] sm:$0xff]  ;;  %v3715_v36 = vld [vmem:[%s3555_s9 + $0x92] sm:$0xff]  ;;  %v3728_v38 = vld [vmem:[%s3555_s9 + $0x20] sm:$0xff] }
  0x28   : > { %2903 = vmatmul.mubr.msk.f32.gmra.mrb[4].mxu1 %vm249_vm1, %v3579_v11  ;;  %3007 = vmatmul.mubr.msk.f32.gmra.mrb[4].mxu0 %vm249_vm1, %v3598_v13  ;;  %v3709_v34 = vld [vmem:[%s3555_s9 + $0x82] sm:$0xff]  ;;  %v3731_v39 = vld [vmem:[%s3555_s9 + $0x9a] sm:$0xff]  ;;  %v3736_v40 = vld [vmem:[%s3555_s9 + $0x30] sm:$0xff] }
  0x29   : > { %2905 = vmatprep.mubr.msk.f32.mxu1 %vm249_vm1, %v3585_v12  ;;  %3009 = vmatprep.mubr.msk.f32.mxu0 %vm249_vm1, %v3601_v14  ;;  %v3739_v41 = vld [vmem:[%s3555_s9 + $0xaa] sm:$0xff]  ;;  %v3751_v42 = vld [vmem:[%s3555_s9 + $0x38] sm:$0xff]  ;;  %v3760_v45 = vld [vmem:[%s3555_s9 + $0xc2] sm:$0xff] }
  0x2a   : > { %v3754_v43 = vld [vmem:[%s3555_s9 + $0xb2] sm:$0xff]  ;;  %v3757_v44 = vld [vmem:[%s3555_s9 + $0x48] sm:$0xff]  ;;  %v3777_v48 = vld [vmem:[%s3555_s9 + $0x60] sm:$0xff] }
  0x2b   : > { %v3771_v46 = vld [vmem:[%s3555_s9 + $0x50] sm:$0xff]  ;;  %v3788_v49 = vld [vmem:[%s3555_s9 + $0x68] sm:$0xff]  ;;  %v3791_v50 = vld [vmem:[%s3555_s9 + $0x78] sm:$0xff] }
  0x2c   : > { %2906 = vmatmul.mubr.msk.f32.gmra.mrb[6].mxu1 %vm249_vm1, %v3598_v13  ;;  %3010 = vmatmul.mubr.msk.f32.gmra.mrb[6].mxu0 %vm249_vm1, %v3612_v15  ;;  %v3774_v47 = vld [vmem:[%s3555_s9 + $0xca] sm:$0xff]  ;;  %v3805_v52 = vld [vmem:[%s3555_s9 + $0x80] sm:$0xff]  ;;  %v3822_v54 = vld [vmem:[%s3555_s9 + $0x98] sm:$0xff] }
  0x2d   : > { %2908 = vmatprep.mubr.msk.f32.mxu1 %vm249_vm1, %v3601_v14  ;;  %3026 = vmatprep.mubr.msk.f32.mxu0 %vm249_vm1, %v3615_v16  ;;  %v3810_v53 = vld [vmem:[%s3555_s9 + $0x90] sm:$0xff]  ;;  %v3825_v55 = vld [vmem:[%s3555_s9 + $0xa8] sm:$0xff]  ;;  %v3856_v59 = vld [vmem:[%s3555_s9 + $0xc0] sm:$0xff] }
  0x2e   : > { %v3836_v56 = vld [vmem:[%s3555_s9 + $0xb0] sm:$0xff]  ;;  %v643_v57 = vld [vmem:[%s3555_s9 + $0x2] sm:$0xff]  ;;  %v2645_v61 = vld [vmem:[%s3555_s9 + $0xd8] sm:$0xff] }
  0x2f   : > { %v644_v58 = vld [vmem:[%s3555_s9 + $0xa] sm:$0xff]  ;;  %v2646_v62 = vld [vmem:[%s3555_s9 + $0xe0] sm:$0xff] }
  0x30   : > { %2909 = vmatmul.mubr.msk.f32.gmra.mrb[8].mxu1 %vm249_vm1, %v3612_v15  ;;  %3027 = vmatmul.mubr.msk.f32.vlgmr.msra.gmra.mrb[0].mxu0 %vm249_vm1, %v3626_v17  ;;  %v2644_v60 = vld [vmem:[%s3555_s9 + $0xc8] sm:$0xff]  ;;  %v2713_v3 = vld [vmem:[%s3555_s9 + $0xda] sm:$0xff] }
  0x31   : > { %3051 = vmatpush3.msk.msra.mxu0 %vm298_vm0, %v2647_v9  ;;  %2911 = vmatprep.mubr.msk.f32.mxu1 %vm249_vm1, %v3629_v18  ;;  %v2677_v63 = vld [vmem:[%s3555_s9 + $0xc1] sm:$0xff]  ;;  %v2678_v0 = vld [vmem:[%s3555_s9 + $0xc9] sm:$0xff] }
  0x32   : > { %3029 = vmatprep.mubr.msk.f32.mxu0 %vm249_vm1, %v3632_v19  ;;  %3076 = vmatprep.subr.msk.mxu0 %vm298_vm0, %v3637_v20  ;;  %v2680_v2 = vld [vmem:[%s3555_s9 + $0xe1] sm:$0xff] }
  0x33   : > { %v2714_v4 = vld [vmem:[%s3555_s9 + $0xe2] sm:$0xff] }
  0x34   : > { %2912 = vmatmul.mubr.msk.f32.gmra.mrb[10].mxu1 %vm249_vm1, %v3647_v21  ;;  %3030 = vmatmul.mubr.msk.f32.gmra.mrb[2].mxu0 %vm249_vm1, %v3650_v22 }
  0x35   : > { %2914 = vmatprep.mubr.msk.f32.mxu1 %vm249_vm1, %v3655_v23  ;;  %3032 = vmatprep.mubr.msk.f32.mxu0 %vm249_vm1, %v3658_v24 }
  0x38   : > { %2915 = vmatmul.mubr.msk.f32.gmra.mrb[12].mxu1 %vm249_vm1, %v3671_v25  ;;  %3033 = vmatmul.mubr.msk.f32.gmra.mrb[4].mxu0 %vm249_vm1, %v3674_v26 }
  0x39   : > { %2917 = vmatprep.mubr.msk.f32.mxu1 %vm249_vm1, %v3677_v27  ;;  %3035 = vmatprep.mubr.msk.f32.mxu0 %vm249_vm1, %v3680_v28 }
  0x3c   : > { %2918 = vmatmul.mubr.msk.f32.gmra.mrb[14].mxu1 %vm249_vm1, %v3691_v29  ;;  %3036 = vmatmul.mubr.msk.f32.gmra.mrb[6].mxu0 %vm249_vm1, %v3694_v30 }
  0x3d   : > { %2922 = vmatprep.mubr.msk.f32.mxu1 %vm249_vm1, %v214_v31  ;;  %3038 = vmatprep.mubr.msk.f32.mxu0 %vm249_vm1, %v3698_v32 }
  0x40   : > { %2923 = vmatmul.mubr.msk.f32.vlgmr.msra.gmra.mrb[0].mxu1 %vm249_vm1, %v215_v33  ;;  %3039 = vmatmul.mubr.msk.f32.gmra.mrb[8].mxu0 %vm249_vm1, %v3709_v34 }
  0x41   : > { %2947 = vmatpush3.msk.msra.mxu1 %vm298_vm0, %v3574_v10  ;;  %2925 = vmatprep.mubr.msk.f32.mxu1 %vm249_vm1, %v3712_v35 }
  0x42   : > { %3041 = vmatprep.mubr.msk.f32.mxu0 %vm249_vm1, %v3715_v36  ;;  %2972 = vmatprep.subr.msk.mxu1 %vm298_vm0, %v2543_v37 }
  0x44   : > { %2926 = vmatmul.mubr.msk.f32.gmra.mrb[2].mxu1 %vm249_vm1, %v3728_v38  ;;  %3042 = vmatmul.mubr.msk.f32.gmra.mrb[10].mxu0 %vm249_vm1, %v3731_v39 }
  0x45   : > { %2928 = vmatprep.mubr.msk.f32.mxu1 %vm249_vm1, %v3736_v40  ;;  %3044 = vmatprep.mubr.msk.f32.mxu0 %vm249_vm1, %v3739_v41 }
  0x48   : > { %2929 = vmatmul.mubr.msk.f32.gmra.mrb[4].mxu1 %vm249_vm1, %v3751_v42  ;;  %3045 = vmatmul.mubr.msk.f32.gmra.mrb[12].mxu0 %vm249_vm1, %v3754_v43 }
  0x49   : > { %2931 = vmatprep.mubr.msk.f32.mxu1 %vm249_vm1, %v3757_v44  ;;  %3047 = vmatprep.mubr.msk.f32.mxu0 %vm249_vm1, %v3760_v45 }
  0x4c   : > { %2932 = vmatmul.mubr.msk.f32.gmra.mrb[6].mxu1 %vm249_vm1, %v3771_v46  ;;  %3048 = vmatmul.mubr.msk.f32.gmra.mrb[14].mxu0 %vm249_vm1, %v3774_v47 }
  0x4d   : > { %2934 = vmatprep.mubr.msk.f32.mxu1 %vm249_vm1, %v3777_v48  ;;  %3052 = vmatprep.mubr.msk.f32.mxu0 %vm249_vm1, %v3736_v40 }
  0x50   : > { %2935 = vmatmul.mubr.msk.f32.gmra.mrb[8].mxu1 %vm249_vm1, %v3788_v49  ;;  %3053 = vmatmul.mubr.msk.f32.vlgmr.msra.gmra.mrb[0].mxu0 %vm249_vm1, %v3751_v42 }
  0x51   : > { %3077 = vmatpush3.msk.msra.mxu0 %vm298_vm0, %v3637_v20  ;;  %2937 = vmatprep.mubr.msk.f32.mxu1 %vm249_vm1, %v3791_v50 }
  0x52   : > { %3055 = vmatprep.mubr.msk.f32.mxu0 %vm249_vm1, %v3757_v44  ;;  %3102 = vmatprep.subr.msk.mxu0 %vm298_vm0, %v2715_v51 }
  0x54   : > { %2938 = vmatmul.mubr.msk.f32.gmra.mrb[10].mxu1 %vm249_vm1, %v3805_v52  ;;  %3056 = vmatmul.mubr.msk.f32.gmra.mrb[2].mxu0 %vm249_vm1, %v3771_v46 }
  0x55   : > { %2940 = vmatprep.mubr.msk.f32.mxu1 %vm249_vm1, %v3810_v53  ;;  %3058 = vmatprep.mubr.msk.f32.mxu0 %vm249_vm1, %v3777_v48 }
  0x58   : > { %2941 = vmatmul.mubr.msk.f32.gmra.mrb[12].mxu1 %vm249_vm1, %v3822_v54  ;;  %3059 = vmatmul.mubr.msk.f32.gmra.mrb[4].mxu0 %vm249_vm1, %v3788_v49 }
  0x59   : > { %2943 = vmatprep.mubr.msk.f32.mxu1 %vm249_vm1, %v3825_v55  ;;  %3061 = vmatprep.mubr.msk.f32.mxu0 %vm249_vm1, %v3791_v50 }
  0x5c   : > { %2944 = vmatmul.mubr.msk.f32.gmra.mrb[14].mxu1 %vm249_vm1, %v3836_v56  ;;  %3062 = vmatmul.mubr.msk.f32.gmra.mrb[6].mxu0 %vm249_vm1, %v3805_v52 }
  0x5d   : > { %2948 = vmatprep.mubr.msk.f32.mxu1 %vm249_vm1, %v643_v57  ;;  %3064 = vmatprep.mubr.msk.f32.mxu0 %vm249_vm1, %v3810_v53 }
  0x60   : > { %2949 = vmatmul.mubr.msk.f32.vlgmr.msra.gmra.mrb[0].mxu1 %vm249_vm1, %v644_v58  ;;  %3065 = vmatmul.mubr.msk.f32.gmra.mrb[8].mxu0 %vm249_vm1, %v3822_v54 }
  0x61   : > { %2973 = vmatpush3.msk.msra.mxu1 %vm298_vm0, %v2543_v37  ;;  %2951 = vmatprep.mubr.msk.f32.mxu1 %vm249_vm1, %v3615_v16 }
  0x62   : > { %3067 = vmatprep.mubr.msk.f32.mxu0 %vm249_vm1, %v3825_v55  ;;  %3128 = vmatprep.subr.msk.mxu1 %vm298_vm0, %v3533_v1 }
  0x64   : > { %2952 = vmatmul.mubr.msk.f32.gmra.mrb[2].mxu1 %vm249_vm1, %v3626_v17  ;;  %3068 = vmatmul.mubr.msk.f32.gmra.mrb[10].mxu0 %vm249_vm1, %v3836_v56 }
  0x65   : > { %2954 = vmatprep.mubr.msk.f32.mxu1 %vm249_vm1, %v3632_v19  ;;  %3070 = vmatprep.mubr.msk.f32.mxu0 %vm249_vm1, %v3856_v59 }
  0x68   : > { %2955 = vmatmul.mubr.msk.f32.gmra.mrb[4].mxu1 %vm249_vm1, %v3650_v22  ;;  %3071 = vmatmul.mubr.msk.f32.gmra.mrb[12].mxu0 %vm249_vm1, %v2644_v60 }
  0x69   : > { %2957 = vmatprep.mubr.msk.f32.mxu1 %vm249_vm1, %v3658_v24  ;;  %3073 = vmatprep.mubr.msk.f32.mxu0 %vm249_vm1, %v2645_v61 }
  0x6c   : > { %2958 = vmatmul.mubr.msk.f32.gmra.mrb[6].mxu1 %vm249_vm1, %v3674_v26  ;;  %3074 = vmatmul.mubr.msk.f32.gmra.mrb[14].mxu0 %vm249_vm1, %v2646_v62 }
  0x6d   : > { %2960 = vmatprep.mubr.msk.f32.mxu1 %vm249_vm1, %v3680_v28  ;;  %3078 = vmatprep.mubr.msk.f32.mxu0 %vm249_vm1, %v3564_v8 }
  0x70   : > { %2961 = vmatmul.mubr.msk.f32.gmra.mrb[8].mxu1 %vm249_vm1, %v3694_v30  ;;  %3079 = vmatmul.mubr.msk.f32.vlgmr.msra.gmra.mrb[0].mxu0 %vm249_vm1, %v3579_v11 }
  0x71   : > { %3103 = vmatpush3.msk.msra.mxu0 %vm298_vm0, %v2715_v51  ;;  %2963 = vmatprep.mubr.msk.f32.mxu1 %vm249_vm1, %v3698_v32 }
  0x72   : > { %3081 = vmatprep.mubr.msk.f32.mxu0 %vm249_vm1, %v3585_v12 }
  0x74   : > { %2964 = vmatmul.mubr.msk.f32.gmra.mrb[10].mxu1 %vm249_vm1, %v3709_v34  ;;  %3082 = vmatmul.mubr.msk.f32.gmra.mrb[2].mxu0 %vm249_vm1, %v3598_v13 }
  0x75   : > { %2966 = vmatprep.mubr.msk.f32.mxu1 %vm249_vm1, %v3715_v36  ;;  %3084 = vmatprep.mubr.msk.f32.mxu0 %vm249_vm1, %v3601_v14  ;;  %v4011_v14 = vld [vmem:[%s4137_s2] ss:$0 sm:$0xff] }
  0x78   : > { %2967 = vmatmul.mubr.msk.f32.gmra.mrb[12].mxu1 %vm249_vm1, %v3731_v39  ;;  %3085 = vmatmul.mubr.msk.f32.gmra.mrb[4].mxu0 %vm249_vm1, %v3612_v15 }
  0x79   : > { %2969 = vmatprep.mubr.msk.f32.mxu1 %vm249_vm1, %v3739_v41  ;;  %3087 = vmatprep.mubr.msk.f32.mxu0 %vm249_vm1, %v3629_v18 }
  0x7c   : > { %2970 = vmatmul.mubr.msk.f32.gmra.mrb[14].mxu1 %vm249_vm1, %v3754_v43  ;;  %3088 = vmatmul.mubr.msk.f32.gmra.mrb[6].mxu0 %vm249_vm1, %v3647_v21 }
  0x7d   : > { %2974 = vmatprep.mubr.msk.f32.mxu1 %vm249_vm1, %v3712_v35  ;;  %3090 = vmatprep.mubr.msk.f32.mxu0 %vm249_vm1, %v3655_v23 }
  0x80   : > { %2975 = vmatmul.mubr.msk.f32.vlgmr.msra.gmra.mrb[0].mxu1 %vm249_vm1, %v3728_v38  ;;  %3091 = vmatmul.mubr.msk.f32.gmra.mrb[8].mxu0 %vm249_vm1, %v3671_v25 }
  0x81   : > { %3129 = vmatpush3.msk.msra.mxu1 %vm298_vm0, %v3533_v1  ;;  %2977 = vmatprep.mubr.msk.f32.mxu1 %vm249_vm1, %v3736_v40  ;;  %v2679_v1 = vld [vmem:[%s3555_s9 + $0xd9] sm:$0xff]  ;;  %s3428_s9 = smov [#allocation3]  }
  0x82   : > { %3093 = vmatprep.mubr.msk.f32.mxu0 %vm249_vm1, %v3677_v27  ;;  %s3336_s10 = sshll.u32 %s3428_s9, 4  ;;  %s3337_s10 = int_to_ptr.vmem [resolvable:$false] %s3336_s10 }
  0x83   : > { %s3338_s12 = scalar_lea.vmem %s3337_s10, 1024  ;;  %p3339_p2 = scmp.lt.s32.totalorder %s4077_s30, %s3337_s10 }
  0x84   : > { %2978 = vmatmul.mubr.msk.f32.gmra.mrb[2].mxu1 %vm249_vm1, %v3751_v42  ;;  %3094 = vmatmul.mubr.msk.f32.gmra.mrb[10].mxu0 %vm249_vm1, %v3691_v29  ;;  %p3340_p4 = scmp.lt.s32.totalorder %s3338_s12, %s3332_s8 }
  0x85   : > { %2980 = vmatprep.mubr.msk.f32.mxu1 %vm249_vm1, %v3757_v44  ;;  %3096 = vmatprep.mubr.msk.f32.mxu0 %vm249_vm1, %v2677_v63 }
  0x86   : > { %p3341_p5 = por %p3340_p4, %p3339_p2 }
  0x88   : > { %2981 = vmatmul.mubr.msk.f32.gmra.mrb[4].mxu1 %vm249_vm1, %v3771_v46  ;;  %3097 = vmatmul.mubr.msk.f32.gmra.mrb[12].mxu0 %vm249_vm1, %v2678_v0  ;;  %p3342_p6 = pnand %p3341_p5, %p3335_p1 }
  0x89   : > { %2983 = vmatprep.mubr.msk.f32.mxu1 %vm249_vm1, %v3777_v48  ;;  %3099 = vmatprep.mubr.msk.f32.mxu0 %vm249_vm1, %v2679_v1 }
  0x8c   : > { %2984 = vmatmul.mubr.msk.f32.gmra.mrb[6].mxu1 %vm249_vm1, %v3788_v49  ;;  %3100 = vmatmul.mubr.msk.f32.gmra.mrb[14].mxu0 %vm249_vm1, %v2680_v2 }
  0x8d   : > { %2986 = vmatprep.mubr.msk.f32.mxu1 %vm249_vm1, %v3791_v50  ;;  %3104 = vmatprep.mubr.msk.f32.mxu0 %vm249_vm1, %v3632_v19  ;;  %v4017_v19 = vld [vmem:[%s4138_s3] ss:$0 sm:$0xff] }
  0x90   : > { %2987 = vmatmul.mubr.msk.f32.gmra.mrb[8].mxu1 %vm249_vm1, %v3805_v52  ;;  %3105 = vmatmul.mubr.msk.f32.vlgmr.msra.gmra.mrb[0].mxu0 %vm249_vm1, %v3650_v22 }
  0x91   : > { %2989 = vmatprep.mubr.msk.f32.mxu1 %vm249_vm1, %v3810_v53  ;;  %3107 = vmatprep.mubr.msk.f32.mxu0 %vm249_vm1, %v3658_v24 }
  0x94   : > { %2990 = vmatmul.mubr.msk.f32.gmra.mrb[10].mxu1 %vm249_vm1, %v3822_v54  ;;  %3108 = vmatmul.mubr.msk.f32.gmra.mrb[2].mxu0 %vm249_vm1, %v3674_v26 }
  0x95   : > { %2992 = vmatprep.mubr.msk.f32.mxu1 %vm249_vm1, %v3825_v55  ;;  %3110 = vmatprep.mubr.msk.f32.mxu0 %vm249_vm1, %v3680_v28 }
  0x98   : > { %2993 = vmatmul.mubr.msk.f32.gmra.mrb[12].mxu1 %vm249_vm1, %v3836_v56  ;;  %3111 = vmatmul.mubr.msk.f32.gmra.mrb[4].mxu0 %vm249_vm1, %v3694_v30 }
  0x99   : > { %2995 = vmatprep.mubr.msk.f32.mxu1 %vm249_vm1, %v3856_v59  ;;  %3113 = vmatprep.mubr.msk.f32.mxu0 %vm249_vm1, %v3698_v32 }
  0x9c   : > { %2996 = vmatmul.mubr.msk.f32.gmra.mrb[14].mxu1 %vm249_vm1, %v2644_v60  ;;  %3114 = vmatmul.mubr.msk.f32.gmra.mrb[6].mxu0 %vm249_vm1, %v3709_v34 }
  0x9d   : > { %3012 = vmatprep.mubr.msk.f32.mxu1 %vm249_vm1, %v3629_v18  ;;  %3116 = vmatprep.mubr.msk.f32.mxu0 %vm249_vm1, %v3715_v36 }
  0xa0   : > { %3013 = vmatmul.mubr.msk.f32.vlgmr.msra.gmra.mrb[8].mxu1 %vm249_vm1, %v3647_v21  ;;  %3117 = vmatmul.mubr.msk.f32.gmra.mrb[8].mxu0 %vm249_vm1, %v3731_v39 }
  0xa1   : > { %3015 = vmatprep.mubr.msk.f32.mxu1 %vm249_vm1, %v3655_v23  ;;  %3119 = vmatprep.mubr.msk.f32.mxu0 %vm249_vm1, %v3739_v41 }
  0xa4   : > { %3016 = vmatmul.mubr.msk.f32.gmra.mrb[10].mxu1 %vm249_vm1, %v3671_v25  ;;  %3120 = vmatmul.mubr.msk.f32.gmra.mrb[10].mxu0 %vm249_vm1, %v3754_v43 }
  0xa5   : > { %3018 = vmatprep.mubr.msk.f32.mxu1 %vm249_vm1, %v3677_v27  ;;  %3122 = vmatprep.mubr.msk.f32.mxu0 %vm249_vm1, %v3760_v45 }
  0xa8   : > { %3019 = vmatmul.mubr.msk.f32.gmra.mrb[12].mxu1 %vm249_vm1, %v3691_v29  ;;  %3123 = vmatmul.mubr.msk.f32.gmra.mrb[12].mxu0 %vm249_vm1, %v3774_v47 }
  0xa9   : > { %3021 = vmatprep.mubr.msk.f32.mxu1 %vm249_vm1, %v2677_v63  ;;  %3125 = vmatprep.mubr.msk.f32.mxu0 %vm249_vm1, %v2713_v3 }
  0xac   : > { %3022 = vmatmul.mubr.msk.f32.gmra.mrb[14].mxu1 %vm249_vm1, %v2678_v0  ;;  %3126 = vmatmul.mubr.msk.f32.gmra.mrb[14].mxu0 %vm249_vm1, %v2714_v4 }
 0x153   : > { %v2976_v5 = vpop.f32.mrb[0].mxu1 }
 0x154   : > { %v1011_v6 = vpop.f32.mrb[1].mxu1 }
 0x157   : > { %v2979_v7 = vpop.f32.mrb[2].mxu1 }
 0x158   : > { %v1021_v8 = vpop.f32.mrb[3].mxu1 }
 0x15b   : > { %v2982_v9 = vpop.f32.mrb[4].mxu1 }
 0x15c   : > { %v1031_v10 = vpop.f32.mrb[5].mxu1 }
 0x15f   : > { %v2985_v11 = vpop.f32.mrb[6].mxu1 }
 0x160   : > { %v1041_v12 = vpop.f32.mrb[7].mxu1 }
 0x163   : > { %v3106_v13 = vpop.f32.mrb[0].mxu0 }
 0x164   : > { %v3130_v15 = vadd.f32 %v3106_v13, %v2976_v5  ;;  %v2164_v16 = vpop.f32.mrb[1].mxu0 }
 0x165   : > { %v3131_v17 = vadd.f32 %v2164_v16, %v1011_v6 }
 0x166   : > { %v2267_v18 = vmul.f32 %v3130_v15, %v4011_v14 }
 0x167   : > { %v2266_v20 = vmul.f32 %v3131_v17, %v4011_v14  ;;  %v3109_v21 = vpop.f32.mrb[2].mxu0 }
 0x168   : > { %v3132_v22 = vadd.f32 %v3109_v21, %v2979_v7  ;;  %v2174_v23 = vpop.f32.mrb[3].mxu0  ;;  %v2290_v25 = vadd.f32 %v4017_v19, %v2267_v18 }
 0x169   : > { %v3133_v24 = vadd.f32 %v2174_v23, %v1021_v8  ;;  %v2289_v27 = vadd.f32 %v4017_v19, %v2266_v20 }
 0x16a   : > { %v2269_v26 = vmul.f32 %v3132_v22, %v4011_v14  ;;  %v2306_v35 = vmax.f32 %v2290_v25, 0.0 }
 0x16b   : > { %v2268_v28 = vmul.f32 %v3133_v24, %v4011_v14  ;;  %v3112_v29 = vpop.f32.mrb[4].mxu0  ;;  %v2305_v38 = vmax.f32 %v2289_v27, 0.0 }
 0x16c   : > { %v2292_v30 = vadd.f32 %v4017_v19, %v2269_v26  ;;  %v3134_v31 = vadd.f32 %v3112_v29, %v2982_v9  ;;  %v2184_v32 = vpop.f32.mrb[5].mxu0 }
 0x16d   : > { %v2291_v33 = vadd.f32 %v4017_v19, %v2268_v28  ;;  %v3135_v34 = vadd.f32 %v2184_v32, %v1031_v10 }
 0x16e   : > { %v2308_v36 = vmax.f32 %v2292_v30, 0.0  ;;  %v2271_v37 = vmul.f32 %v3134_v31, %v4011_v14 }
 0x16f   : > { %v2307_v39 = vmax.f32 %v2291_v33, 0.0  ;;  %v2270_v40 = vmul.f32 %v3135_v34, %v4011_v14  ;;  %v3115_v41 = vpop.f32.mrb[6].mxu0 }
 0x170   : > { %v2322_v42 = vmax.f32 %v2306_v35, %v2308_v36  ;;  %v3136_v43 = vadd.f32 %v3115_v41, %v2985_v11  ;;  %v2194_v44 = vpop.f32.mrb[7].mxu0  ;;  %v2294_v47 = vadd.f32 %v4017_v19, %v2271_v37 }
 0x171   : > { %v2321_v45 = vmax.f32 %v2305_v38, %v2307_v39  ;;  %v3137_v46 = vadd.f32 %v2194_v44, %v1041_v12  ;;  %v2293_v49 = vadd.f32 %v4017_v19, %v2270_v40 }
 0x172   : > { %2331 = vst.msk [vmem:[#allocation2 + $0x8] sm:$0xff] %vm2329_vm2, %v2322_v42  ;;  %v2273_v48 = vmul.f32 %v3136_v43, %v4011_v14  ;;  %v2310_v59 = vmax.f32 %v2294_v47, 0.0 }
 0x173   : > { %2330 = vst.msk [vmem:[#allocation2] sm:$0xff] %vm2329_vm2, %v2321_v45  ;;  %v2272_v50 = vmul.f32 %v3137_v46, %v4011_v14  ;;  %v3014_v51 = vpop.f32.mrb[8].mxu1  ;;  %v3118_v52 = vpop.f32.mrb[8].mxu0  ;;  %v2309_v62 = vmax.f32 %v2293_v49, 0.0 }
 0x174   : > { %v2296_v53 = vadd.f32 %v4017_v19, %v2273_v48  ;;  %v3138_v54 = vadd.f32 %v3118_v52, %v3014_v51  ;;  %v1281_v55 = vpop.f32.mrb[9].mxu1  ;;  %v2204_v56 = vpop.f32.mrb[9].mxu0 }
 0x175   : > { %v2295_v57 = vadd.f32 %v4017_v19, %v2272_v50  ;;  %v3139_v58 = vadd.f32 %v2204_v56, %v1281_v55 }
 0x176   : > { %v2312_v60 = vmax.f32 %v2296_v53, 0.0  ;;  %v2275_v61 = vmul.f32 %v3138_v54, %v4011_v14 }
 0x177   : > { %v2311_v63 = vmax.f32 %v2295_v57, 0.0  ;;  %v2274_v0 = vmul.f32 %v3139_v58, %v4011_v14  ;;  %v3017_v1 = vpop.f32.mrb[10].mxu1  ;;  %v3121_v2 = vpop.f32.mrb[10].mxu0 }
 0x178   : > { %v2324_v3 = vmax.f32 %v2310_v59, %v2312_v60  ;;  %v3140_v4 = vadd.f32 %v3121_v2, %v3017_v1  ;;  %v1291_v5 = vpop.f32.mrb[11].mxu1  ;;  %v2214_v6 = vpop.f32.mrb[11].mxu0  ;;  %v2298_v9 = vadd.f32 %v4017_v19, %v2275_v61 }
 0x179   : > { %v2323_v7 = vmax.f32 %v2309_v62, %v2311_v63  ;;  %v3141_v8 = vadd.f32 %v2214_v6, %v1291_v5  ;;  %v2297_v13 = vadd.f32 %v4017_v19, %v2274_v0 }
 0x17a   : > { %2333 = vst.msk [vmem:[#allocation2 + $0x18] sm:$0xff] %vm2329_vm2, %v2324_v3  ;;  %v2277_v10 = vmul.f32 %v3140_v4, %v4011_v14  ;;  %v2338_v11 = vld [vmem:[#allocation2] ss:$2 sm:$0xff]  ;;  %v2346_v12 = vld [vmem:[#allocation2 + $0x1] ss:$2 sm:$0xff]  ;;  %v2314_v26 = vmax.f32 %v2298_v9, 0.0 }
 0x17b   : > { %2332 = vst.msk [vmem:[#allocation2 + $0x10] sm:$0xff] %vm2329_vm2, %v2323_v7  ;;  %v2276_v15 = vmul.f32 %v3141_v8, %v4011_v14  ;;  %v3020_v16 = vpop.f32.mrb[12].mxu1  ;;  %v3124_v17 = vpop.f32.mrb[12].mxu0  ;;  %v2353_v18 = vmax.f32 %v2338_v11, %v2346_v12  ;;  %v2313_v29 = vmax.f32 %v2297_v13, 0.0 }
 0x17c   : > { %v2300_v20 = vadd.f32 %v4017_v19, %v2277_v10  ;;  %v3142_v21 = vadd.f32 %v3124_v17, %v3020_v16  ;;  %v1301_v22 = vpop.f32.mrb[13].mxu1  ;;  %v2224_v23 = vpop.f32.mrb[13].mxu0 }
 0x17d   : > { %v2299_v24 = vadd.f32 %v4017_v19, %v2276_v15  ;;  %v3143_v25 = vadd.f32 %v2224_v23, %v1301_v22  ;;  %2357 = vst.msk [vmem:[%s4049_s13] sm:$0xff] %vm2329_vm2, %v2353_v18 }
 0x17e   : > { %v2316_v27 = vmax.f32 %v2300_v20, 0.0  ;;  %v2279_v28 = vmul.f32 %v3142_v21, %v4011_v14 }
 0x17f   : > { %v2315_v30 = vmax.f32 %v2299_v24, 0.0  ;;  %v2278_v31 = vmul.f32 %v3143_v25, %v4011_v14  ;;  %v3023_v32 = vpop.f32.mrb[14].mxu1  ;;  %v3127_v33 = vpop.f32.mrb[14].mxu0 }
 0x180   : > { %v2326_v34 = vmax.f32 %v2314_v26, %v2316_v27  ;;  %v3144_v35 = vadd.f32 %v3127_v33, %v3023_v32  ;;  %v1311_v36 = vpop.f32.mrb[15].mxu1  ;;  %v2234_v37 = vpop.f32.mrb[15].mxu0  ;;  %v2302_v40 = vadd.f32 %v4017_v19, %v2279_v28 }
 0x181   : > { %v2325_v38 = vmax.f32 %v2313_v29, %v2315_v30  ;;  %v3145_v39 = vadd.f32 %v2234_v37, %v1311_v36  ;;  %v2301_v44 = vadd.f32 %v4017_v19, %v2278_v31 }
 0x182   : > { %2335 = vst.msk [vmem:[#allocation2 + $0x28] sm:$0xff] %vm2329_vm2, %v2326_v34  ;;  %v2281_v41 = vmul.f32 %v3144_v35, %v4011_v14  ;;  %v2340_v42 = vld [vmem:[#allocation2 + $0x10] ss:$2 sm:$0xff]  ;;  %v2348_v43 = vld [vmem:[#allocation2 + $0x11] ss:$2 sm:$0xff]  ;;  %v2318_v49 = vmax.f32 %v2302_v40, 0.0 }
 0x183   : > { %2334 = vst.msk [vmem:[#allocation2 + $0x20] sm:$0xff] %vm2329_vm2, %v2325_v38  ;;  %v2280_v45 = vmul.f32 %v3145_v39, %v4011_v14  ;;  %v2354_v46 = vmax.f32 %v2340_v42, %v2348_v43  ;;  %v2317_v51 = vmax.f32 %v2301_v44, 0.0 }
 0x184   : > { %v2304_v47 = vadd.f32 %v4017_v19, %v2281_v41 }
 0x185   : > { %v2303_v48 = vadd.f32 %v4017_v19, %v2280_v45  ;;  %2358 = vst.msk [vmem:[%s4049_s13 + $0x8] sm:$0xff] %vm2329_vm2, %v2354_v46 }
 0x186   : > { %v2320_v50 = vmax.f32 %v2304_v47, 0.0 }
 0x187   : > { %v2319_v52 = vmax.f32 %v2303_v48, 0.0 }
 0x188   : > { %v2328_v53 = vmax.f32 %v2318_v49, %v2320_v50 }
 0x189   : > { %v2327_v54 = vmax.f32 %v2317_v51, %v2319_v52 }
 0x18a   : > { %2337 = vst.msk [vmem:[#allocation2 + $0x38] sm:$0xff] %vm2329_vm2, %v2328_v53  ;;  %v2342_v14 = vld [vmem:[#allocation2 + $0x20] ss:$2 sm:$0xff]  ;;  %v2350_v55 = vld [vmem:[#allocation2 + $0x21] ss:$2 sm:$0xff] }
 0x18b   : > { %2336 = vst.msk [vmem:[#allocation2 + $0x30] sm:$0xff] %vm2329_vm2, %v2327_v54  ;;  %v2355_v19 = vmax.f32 %v2342_v14, %v2350_v55 }
 0x18d   : > { %2359 = vst.msk [vmem:[%s4049_s13 + $0x10] sm:$0xff] %vm2329_vm2, %v2355_v19 }
 0x192   : > { %v2344_v56 = vld [vmem:[#allocation2 + $0x30] ss:$2 sm:$0xff]  ;;  %v2352_v57 = vld [vmem:[#allocation2 + $0x31] ss:$2 sm:$0xff] }
 0x193   : > { %v2356_v58 = vmax.f32 %v2344_v56, %v2352_v57 }
 0x195   : > { %2360 = vst.msk [vmem:[%s4049_s13 + $0x18] sm:$0xff] %vm2329_vm2, %v2356_v58 }
 0x196   : > { %3345 = shalt.err (!%p3342_p6)
}
 0x197   : > { %s3346_s11 = scalar_lea.hbm %s4075_s19, 512  ;;  %s3350_s23 = scalar_lea.hbm %s4139_s4, 2048 }
 0x198   : > { %p3347_p7 = scmp.ne.s32.totalorder %s4075_s19, %s3346_s11  ;;  %p3351_p11 = scmp.lt.u32.totalorder %s4075_s19, %s4139_s4 }
 0x199   : > { %p3352_p12 = scmp.lt.u32.totalorder %s3350_s23, %s3346_s11  ;;  %p3354_p0 = scmp.lt.u32.totalorder %s3346_s11, %s4075_s19 }
 0x19a   : > { %p3348_p9 = pnand %p3347_p7, %p3507_p3 }
 0x19b   : > { %p3353_p13 = por %p3352_p12, %p3351_p11 }
 0x19c   : > { %p3349_p10 = pneg %p3348_p9 }
 0x19d   : > { %p3355_p1 = por %p3354_p0, %p3353_p13 }
 0x19f   : > { %p3356_p2 = pnand %p3355_p1, %p3349_p10 }
 0x1a1   : > { %3359 = shalt.err (!%p3356_p2)
}
 0x1a2   : > { %s3429_s5 = smov 128   ;;  %s3430_s18 = smov 8  }
 0x1a3   : > { %3259 = dma.vmem_to_hbm [thread:$0]  (%p3507_p3), %s4077_s30, 512, %s4075_s19, %s4083_s6, %s3429_s5, %s3429_s5, %s3430_s18  }
 0x1a4 PF: > { %p3265_p4 = scmp.ge.s32.totalorder %s3426_s22, 2  ;;  %s2392_s8 = sand.u32 1, %s3398_s15  }
 0x1a5   : > { %s2393_s9 = scalar_lea.sflag [#allocation4], %s2392_s8 }
 0x1a6   : > { %p3262_p5 = pnand %p3265_p4, %p3516_p8 }
 0x1a8   : > { %3393 = dma.done.wait (!%p3262_p5), %s2393_s9, 512  }
 0x1a9   : > { %3395 = vsyncadd (!%p3262_p5), %s2393_s9, 4294966784  ;;  %s17_s22 = sadd.s32 1, %s3426_s22   ;;  %s4142_s15 = smov %s3402_s16 }
 0x1aa   : > { %p14_p6 = scmp.ge.s32.totalorder %s17_s22, 6   ;;  %s4143_s16 = smov %s3406_s17 }
 0x1ab   : > { %s4144_s17 = smov %s3525_s7  ;;  %s4145_s18 = smov %s3418_s20 }
 0x1ac   : > { %s4146_s19 = smov %s3422_s21  ;;  %s4147_s20 = smov %s4150_s25 }
 0x1ad   : > { %s4148_s21 = smov %s4154_s26  ;;  %16 = sbr.rel (!%p14_p6) target bundleno = 5 (0x5), region = 89 }
 0x1b4   :  { %2398 = vsyncpa [#allocation4], 1 }
 0x1b5   :  { %2400 = vsyncpa [#allocation4 + $0x1], 1 }

</bundles_post_ra>
